<compile_context>
chip_gen: v6e
topology: v6e:2x2x1
jax: 0.10.0
libtpu: 0.0.40
codegen_flags: <defaults>
</compile_context>

<pallas_src>
import jax
import jax.numpy as jnp
from jax.experimental import pallas as pl
from jax.experimental.pallas import tpu as pltpu

IN_DIM = 28 * 28   # 784  (input_dim | 784)
HID_DIM = 128      # 128  (input_dim_2 | 128)
OUT_DIM = 10       # 10   (out_dim | 10)
OUT_PAD = 128      # lane-dense padded output width (10 -> 128)
MAX_TB = 2048      # batch tile (rows per grid step), multiple of 8


def _round_up(n: int, m: int) -> int:
    return ((n + m - 1) // m) * m


def _mlp_kernel(x_ref, w1_ref, b1_ref, w2_ref, b2_ref, o_ref):
    # x_ref:  (TB, 784)  f32/bf16   w1_ref: (784, 128) bf16   b1_ref: (1, 128) f32
    # w2_ref: (128, 128) bf16       b2_ref: (1, 128)   f32    o_ref:  (TB, 128) bf16
    #
    # Per-tile bf16 cast of x happens here (VPU, hidden under DMA) instead of a
    # separate memory-bound XLA pass in the wrapper.
    x = x_ref[...].astype(jnp.bfloat16)
    h = jnp.dot(x, w1_ref[...], preferred_element_type=jnp.float32)
    h = jnp.maximum(h + b1_ref[...], 0.0)                       # f32 bias + ReLU (VPU)
    y = jnp.dot(h.astype(jnp.bfloat16), w2_ref[...],
                preferred_element_type=jnp.float32)
    o_ref[...] = (y + b2_ref[...]).astype(o_ref.dtype)          # cast-on-store (bf16)


def prepare_params(w1, b1, w2, b2):
    """One-time weight prep (hoisted out of the hot path).

    Torch layout in:  w1 (HID, IN), b1 (HID,), w2 (OUT, HID), b2 (OUT,)
    Kernel layout out: w1t (IN, HID) bf16, b1r (1, HID) f32,
                       w2t (HID, OUT_PAD) bf16 (zero-padded), b2r (1, OUT_PAD) f32.
    """
    w1t = jnp.asarray(w1, jnp.float32).T.astype(jnp.bfloat16)          # (784, 128)
    b1r = jnp.asarray(b1, jnp.float32).reshape(1, HID_DIM)             # (1, 128)

    w2t = jnp.asarray(w2, jnp.float32).T                               # (128, 10)
    w2t = jnp.pad(w2t, ((0, 0), (0, OUT_PAD - OUT_DIM))).astype(jnp.bfloat16)
    b2r = jnp.pad(jnp.asarray(b2, jnp.float32), (0, OUT_PAD - OUT_DIM)).reshape(1, OUT_PAD)
    return w1t, b1r, w2t, b2r


def simple_nn_forward_padded(x, params):
    """Perf-critical entry point: returns lane-dense (B, OUT_PAD) bf16 logits.

    Columns [OUT_DIM:] are the bias-pad zeros; consumers should index [:, :10]
    lazily (e.g. inside their own fused op) rather than materializing a slice.
    x: any shape whose elements total a multiple of 784 (e.g. (B, 1, 28, 28)),
    f32 or bf16 — no wrapper-side dtype conversion pass is done.
    """
    w1t, b1r, w2t, b2r = params

    # == torch .view(-1, 784): a free metadata reshape (no cast -> no HBM copy).
    x2d = x.reshape(-1, IN_DIM)
    B = x2d.shape[0]

    # Batch tile: multiple of 8 sublanes, capped at MAX_TB.  Edge blocks (B not
    # a multiple of TB) are masked by Pallas; pad rows never reach the output
    # array and every row is independent (no cross-row reduction in-kernel).
    TB = min(MAX_TB, _round_up(max(B, 1), 8))
    grid = (pl.cdiv(B, TB),)

    return pl.pallas_call(
        _mlp_kernel,
        out_shape=jax.ShapeDtypeStruct((B, OUT_PAD), jnp.bfloat16),
        grid=grid,
        in_specs=[
            pl.BlockSpec((TB, IN_DIM), lambda i: (i, 0)),       # streamed x tiles
            pl.BlockSpec((IN_DIM, HID_DIM), lambda i: (0, 0)),  # resident weights
            pl.BlockSpec((1, HID_DIM), lambda i: (0, 0)),
            pl.BlockSpec((HID_DIM, OUT_PAD), lambda i: (0, 0)),
            pl.BlockSpec((1, OUT_PAD), lambda i: (0, 0)),
        ],
        out_specs=pl.BlockSpec((TB, OUT_PAD), lambda i: (i, 0)),
        compiler_params=pltpu.CompilerParams(
            dimension_semantics=("parallel",),                  # megacore sharding
            vmem_limit_bytes=48 * 1024 * 1024,                  # safe on v5e/v6e/v7x
        ),
    )(x2d, w1t, b1r, w2t, b2r)


def simple_nn_forward(x, params):
    """Module-semantics wrapper: (B, OUT_DIM) logits (thin view of padded out)."""
    return simple_nn_forward_padded(x, params)[:, :OUT_DIM]


def _init_params(key):
    """Deterministic init mimicking torch.nn.Linear default (U[-1/sqrt(fan_in), +])."""
    k1, k2, k3, k4 = jax.random.split(key, 4)
    bound1 = 1.0 / jnp.sqrt(IN_DIM)
    bound2 = 1.0 / jnp.sqrt(HID_DIM)
    w1 = jax.random.uniform(k1, (HID_DIM, IN_DIM), jnp.float32, -bound1, bound1)
    b1 = jax.random.uniform(k2, (HID_DIM,), jnp.float32, -bound1, bound1)
    w2 = jax.random.uniform(k3, (OUT_DIM, HID_DIM), jnp.float32, -bound2, bound2)
    b2 = jax.random.uniform(k4, (OUT_DIM,), jnp.float32, -bound2, bound2)
    return w1, b1, w2, b2


if __name__ == "__main__":
    key = jax.random.PRNGKey(0)
    kx, kp = jax.random.split(key)

    # MNIST-like NCHW input: batch=2, channels=1, 28x28 spatial (f32, no pre-cast).
    x = jax.random.normal(kx, (2, 1, 28, 28), jnp.float32)
    w1, b1, w2, b2 = _init_params(kp)

    params = prepare_params(w1, b1, w2, b2)          # one-time weight prep
    y_pad = simple_nn_forward_padded(x, params)      # (2, 128) bf16, lane-dense
    y_pad = jax.block_until_ready(y_pad)
    assert y_pad.shape == (2, OUT_PAD)

    y = simple_nn_forward(x, params)                 # (2, 10) module-semantics view
    y = jax.block_until_ready(y)
    assert y.shape == (2, OUT_DIM)
    y32 = y.astype(jnp.float32)

    # Reference 1: identical bf16-feed / f32-accumulate / bf16-store math in JAX.
    w1t, b1r, w2t, b2r = params
    x2d = x.reshape(-1, IN_DIM).astype(jnp.bfloat16)
    h_ref = jnp.maximum(
        jnp.dot(x2d, w1t, preferred_element_type=jnp.float32) + b1r, 0.0)
    ref_bf = (jnp.dot(h_ref.astype(jnp.bfloat16), w2t,
                      preferred_element_type=jnp.float32)
              + b2r).astype(jnp.bfloat16)[:, :OUT_DIM].astype(jnp.float32)
    assert jnp.allclose(y32, ref_bf, atol=1e-2, rtol=1e-2)

    # Reference 2: full-f32 PyTorch-equivalent math (loose bf16 tolerance).
    ref32 = jnp.maximum(x.reshape(-1, IN_DIM) @ w1.T + b1, 0.0) @ w2.T + b2
    assert jnp.allclose(y32, ref32, atol=1e-1, rtol=1e-1)

    # Padded columns must be exactly the pad zeros (unused bias pad).
    assert jnp.all(y_pad[:, OUT_DIM:].astype(jnp.float32) == 0.0)

    print("KERNEL_OK")
</pallas_src>

<mosaic_0001>
module attributes {stable_mosaic.version = 11 : i64} {
  func.func @_mlp_kernel(%arg0: i32, %arg1: memref<8x784xf32, #tpu.memory_space<vmem>>, %arg2: memref<784x128xbf16, #tpu.memory_space<vmem>>, %arg3: memref<1x128xf32, #tpu.memory_space<vmem>>, %arg4: memref<128x128xbf16, #tpu.memory_space<vmem>>, %arg5: memref<1x128xf32, #tpu.memory_space<vmem>>, %arg6: memref<8x128xbf16, #tpu.memory_space<vmem>>) attributes {dimension_semantics = [#tpu.dimension_semantics<parallel>], iteration_bounds = array<i64: 1>, scalar_prefetch = 0 : i64, scratch_operands = 0 : i64, tpu.core_type = #tpu.core_type<tc>, window_params = [{transform_indices = @transform_0, window_bounds = array<i64: 8, 784>}, {pipeline_mode = #tpu.pipeline_mode<synchronous>, transform_indices = @transform_1, window_bounds = array<i64: 784, 128>}, {pipeline_mode = #tpu.pipeline_mode<synchronous>, transform_indices = @transform_2, window_bounds = array<i64: 1, 128>}, {pipeline_mode = #tpu.pipeline_mode<synchronous>, transform_indices = @transform_3, window_bounds = array<i64: 128, 128>}, {pipeline_mode = #tpu.pipeline_mode<synchronous>, transform_indices = @transform_4, window_bounds = array<i64: 1, 128>}, {transform_indices = @transform_5, window_bounds = array<i64: 8, 128>}]} {
    %c0 = arith.constant 0 : index
    %c0_0 = arith.constant 0 : index
    %0 = vector.load %arg1[%c0, %c0_0] : memref<8x784xf32, #tpu.memory_space<vmem>>, vector<8x784xf32>
    %1 = arith.truncf %0 : vector<8x784xf32> to vector<8x784xbf16>
    %c0_1 = arith.constant 0 : index
    %c0_2 = arith.constant 0 : index
    %2 = vector.load %arg2[%c0_1, %c0_2] : memref<784x128xbf16, #tpu.memory_space<vmem>>, vector<784x128xbf16>
    %cst = arith.constant dense<0.000000e+00> : vector<8x128xf32>
    %3 = tpu.matmul %1, %2, %cst {dimension_numbers = #tpu.dot_dimension_numbers<[1], [0], [0], [1], [0, 0, 1, 1], [], []>} : vector<8x784xbf16>, vector<784x128xbf16>, vector<8x128xf32> -> vector<8x128xf32>
    %c0_3 = arith.constant 0 : index
    %c0_4 = arith.constant 0 : index
    %4 = vector.load %arg3[%c0_3, %c0_4] : memref<1x128xf32, #tpu.memory_space<vmem>>, vector<1x128xf32>
    %5 = vector.broadcast %4 : vector<1x128xf32> to vector<8x128xf32>
    %6 = arith.addf %3, %5 : vector<8x128xf32>
    %cst_5 = arith.constant 0.000000e+00 : f32
    %7 = vector.broadcast %cst_5 : f32 to vector<8x128xf32>
    %8 = arith.maximumf %6, %7 : vector<8x128xf32>
    %9 = arith.truncf %8 : vector<8x128xf32> to vector<8x128xbf16>
    %c0_6 = arith.constant 0 : index
    %c0_7 = arith.constant 0 : index
    %10 = vector.load %arg4[%c0_6, %c0_7] : memref<128x128xbf16, #tpu.memory_space<vmem>>, vector<128x128xbf16>
    %cst_8 = arith.constant dense<0.000000e+00> : vector<8x128xf32>
    %11 = tpu.matmul %9, %10, %cst_8 {dimension_numbers = #tpu.dot_dimension_numbers<[1], [0], [0], [1], [0, 0, 1, 1], [], []>} : vector<8x128xbf16>, vector<128x128xbf16>, vector<8x128xf32> -> vector<8x128xf32>
    %c0_9 = arith.constant 0 : index
    %c0_10 = arith.constant 0 : index
    %12 = vector.load %arg5[%c0_9, %c0_10] : memref<1x128xf32, #tpu.memory_space<vmem>>, vector<1x128xf32>
    %13 = vector.broadcast %12 : vector<1x128xf32> to vector<8x128xf32>
    %14 = arith.addf %11, %13 : vector<8x128xf32>
    %15 = arith.truncf %14 : vector<8x128xf32> to vector<8x128xbf16>
    %c0_11 = arith.constant 0 : index
    %c0_12 = arith.constant 0 : index
    %16 = vector.load %arg6[%c0_11, %c0_12] : memref<8x128xbf16, #tpu.memory_space<vmem>>, vector<8x128xbf16>
    tpu.vector_store %arg6[%c0_11, %c0_12], %15 {strides = array<i32>} : memref<8x128xbf16, #tpu.memory_space<vmem>>, vector<8x128xbf16>,
    return
  }
  func.func @transform_0(%arg0: i32) -> (i32, i32) {
    %c0_i32 = arith.constant 0 : i32
    %c0_i32_0 = arith.constant 0 : i32
    return %arg0, %c0_i32 : i32, i32
  }
  func.func @transform_1(%arg0: i32) -> (i32, i32) {
    %c0_i32 = arith.constant 0 : i32
    %c0_i32_0 = arith.constant 0 : i32
    %c0_i32_1 = arith.constant 0 : i32
    return %c0_i32, %c0_i32_0 : i32, i32
  }
  func.func @transform_2(%arg0: i32) -> (i32, i32) {
    %c0_i32 = arith.constant 0 : i32
    %c0_i32_0 = arith.constant 0 : i32
    %c0_i32_1 = arith.constant 0 : i32
    return %c0_i32, %c0_i32_0 : i32, i32
  }
  func.func @transform_3(%arg0: i32) -> (i32, i32) {
    %c0_i32 = arith.constant 0 : i32
    %c0_i32_0 = arith.constant 0 : i32
    %c0_i32_1 = arith.constant 0 : i32
    return %c0_i32, %c0_i32_0 : i32, i32
  }
  func.func @transform_4(%arg0: i32) -> (i32, i32) {
    %c0_i32 = arith.constant 0 : i32
    %c0_i32_0 = arith.constant 0 : i32
    %c0_i32_1 = arith.constant 0 : i32
    return %c0_i32, %c0_i32_0 : i32, i32
  }
  func.func @transform_5(%arg0: i32) -> (i32, i32) {
    %c0_i32 = arith.constant 0 : i32
    %c0_i32_0 = arith.constant 0 : i32
    return %arg0, %c0_i32 : i32, i32
  }
}

</mosaic_0001>

<bundles_post_ra>
// kernel: tpu_custom_call.1
= control target key start
LH: loop header
LB: loop body
LE: loop exit
PB: predicated region body
PF: predicated region fallthrough
CT: control target
= control target key end

     0   :  { %10 = vsyncpa [#allocation3], 0  ;;  %s1321_s0 = inlined_call_operand.hbm [shape: f32[2,784], index: 0, kind: input, shape index: {}]   ;;  %s1322_s1 = inlined_call_operand.hbm [shape: bf16[784,128], index: 1, kind: input, shape index: {}]   ;;  %s1323_s2 = inlined_call_operand.vmem [shape: f32[1,128], index: 2, kind: input, shape index: {}]   ;;  %s1324_s3 = inlined_call_operand.hbm [shape: bf16[128,128], index: 3, kind: input, shape index: {}]   ;;  %s1325_s4 = inlined_call_operand.vmem [shape: f32[1,128], index: 4, kind: input, shape index: {}]   ;;  %s1326_s5 = inlined_call_operand.hbm [shape: bf16[2,128], index: 5, kind: output, shape index: {}]  }
   0x1   :  { %11 = vsyncpa [#allocation6], 0 }
   0x2   :  { %12 = vsyncpa [#allocation4], 0 }
   0x3   :  { %17 = vsyncadd [#allocation3], 672  ;;  %s1226_s18 = smov [#allocation5]  }
   0x4   :  { %s30_s19 = sshll.u32 %s1226_s18, 4  ;;  %s31_s19 = int_to_ptr.vmem [resolvable:$true] %s30_s19 }
   0x5   :  { %s1148_s20 = scalar_lea.vmem %s31_s19, 6272  ;;  %p1153_p1 = scmp.lt.s32.totalorder %s31_s19, %s31_s19 }
   0x6   :  { %p1149_p0 = scmp.ne.s32.totalorder %s31_s19, %s1148_s20  ;;  %p1154_p2 = scmp.lt.s32.totalorder %s1148_s20, %s1148_s20 }
   0x8   :  { %p1155_p3 = por %p1154_p2, %p1153_p1 }
   0xa   :  { %p1156_p4 = pnand %p1155_p3, %p1149_p0 }
   0xc   :  { %1159 = shalt.err (!%p1156_p4)
}
   0xd   :  { %s1227_s21 = smov 64   ;;  %s1228_s22 = smov 4  }
   0xe   :  { %36 = dma.hbm_to_vmem [thread:$0]  %s1322_s1, 6272, %s31_s19, [#allocation6], %s1227_s21, %s1227_s21, %s1228_s22  }
   0xf   :  { %s1229_s25 = smov [#allocation2]  }
  0x10   :  { %s18_s26 = sshll.u32 %s1229_s25, 4  ;;  %s19_s26 = int_to_ptr.vmem [resolvable:$true] %s18_s26 }
  0x11   :  { %s1168_s27 = scalar_lea.vmem %s19_s26, 224  ;;  %s1172_s28 = scalar_lea.vmem %s19_s26, 896 }
  0x12   :  { %p1169_p5 = scmp.ne.s32.totalorder %s19_s26, %s1168_s27  ;;  %p1173_p6 = scmp.lt.s32.totalorder %s19_s26, %s19_s26 }
  0x13   :  { %p1174_p7 = scmp.lt.s32.totalorder %s1172_s28, %s1168_s27 }
  0x15   :  { %p1175_p8 = por %p1174_p7, %p1173_p6 }
  0x17   :  { %p1176_p9 = pnand %p1175_p8, %p1169_p5 }
  0x19   :  { %1179 = shalt.err (!%p1176_p9)
}
  0x1a   :  { %s1230_s29 = smov 224   ;;  %s1231_s30 = smov 14  }
  0x1b   :  { %24 = dma.hbm_to_vmem [thread:$0]  %s1321_s0, 224, %s19_s26, [#allocation3], %s1230_s29, %s1230_s29, %s1231_s30  }
  0x1c   :  { %s1232_s8 = smov [#allocation7]  }
  0x1d   :  { %s44_s9 = sshll.u32 %s1232_s8, 4  ;;  %s45_s9 = int_to_ptr.vmem [resolvable:$true] %s44_s9 }
  0x1e   :  { %s1188_s1 = scalar_lea.vmem %s45_s9, 1024  ;;  %p1193_p11 = scmp.lt.s32.totalorder %s45_s9, %s45_s9 }
  0x1f   :  { %p1189_p10 = scmp.ne.s32.totalorder %s45_s9, %s1188_s1  ;;  %p1194_p12 = scmp.lt.s32.totalorder %s1188_s1, %s1188_s1 }
  0x21   :  { %p1195_p13 = por %p1194_p12, %p1193_p11 }
  0x23   :  { %p1196_p0 = pnand %p1195_p13, %p1189_p10 }
  0x25   :  { %1199 = shalt.err (!%p1196_p0)
}
  0x26   :  { %50 = dma.hbm_to_vmem [thread:$0]  %s1324_s3, 1024, %s45_s9, [#allocation6], %s1227_s21, %s1227_s21, %s1228_s22  }
  0x27   :  { %1220 = dma.done.wait [#allocation3], 896  }
  0x28   :  { %1221 = vsyncadd [#allocation3], 4294966400 }
  0x29   :  { %1222 = dma.done.wait [#allocation6], 7296  }
  0x2a   :  { %1223 = vsyncadd [#allocation6], 4294960000  ;;  %v1071_v0 = vld [vmem:[#allocation5 + $0x78] sm:$0xff]   ;;  %v1075_v4 = vld [vmem:[#allocation5 + $0x70] sm:$0xff]   ;;  %v1233_v23 = vmov 1983009808   ;;  %v86_v25 = vlaneseq }
  0x2b   :  { %v1072_v1 = vld [vmem:[#allocation5 + $0x38] sm:$0xff]   ;;  %954 = vmatprep.subr.bf16.mxu0 %v1071_v0  ;;  %v1076_v5 = vld [vmem:[#allocation5 + $0x30] sm:$0xff]   ;;  %v1079_v8 = vld [vmem:[#allocation5 + $0x68] sm:$0xff]   ;;  %v84_v24 = vunpack.c.l.s4 %v1233_v23  ;;  %v1234_v47 = vmov 0.0   ;;  %vm1235_vm0 = vmmov 0   ;;  %vm563_vm1 = vcmask 130048  }
  0x2c   :  { %v1073_v2 = vld [vmem:[#allocation5 + $0xf8] sm:$0xff]   ;;  %955 = vmatpush3.bf16.msra.mxu0 %v1072_v1  ;;  %v1077_v6 = vld [vmem:[#allocation5 + $0xf0] sm:$0xff]   ;;  %v1080_v9 = vld [vmem:[#allocation5 + $0x28] sm:$0xff]   ;;  %v1285_v31 = vshrl.u32 %v86_v25, 7 }
  0x2d   :  { %v1074_v3 = vld [vmem:[#allocation5 + $0xb8] sm:$0xff]   ;;  %976 = vmatprep.subr.bf16.mxu1 %v1073_v2  ;;  %956 = vmatprep.subr.bf16.mxu0 %v1075_v4  ;;  %v1078_v7 = vld [vmem:[#allocation5 + $0xb0] sm:$0xff]   ;;  %v1081_v10 = vld [vmem:[#allocation5 + $0xe8] sm:$0xff]   ;;  %v85_v30 = vunpack.c.0.s8 %v84_v24 }
  0x2e   :  { %977 = vmatpush3.bf16.msra.mxu1 %v1074_v3  ;;  %v1082_v11 = vld [vmem:[#allocation5 + $0xa8] sm:$0xff]   ;;  %v1083_v12 = vld [vmem:[#allocation5 + $0x60] sm:$0xff]   ;;  %v1087_v16 = vld [vmem:[#allocation5 + $0x58] sm:$0xff]  }
  0x2f   :  { %978 = vmatprep.subr.bf16.mxu1 %v1077_v6  ;;  %v1084_v13 = vld [vmem:[#allocation5 + $0x20] sm:$0xff]   ;;  %v1088_v17 = vld [vmem:[#allocation5 + $0x18] sm:$0xff]   ;;  %v1091_v20 = vld [vmem:[#allocation5 + $0x50] sm:$0xff]   ;;  %v1288_v36 = vsub.s32 %v85_v30, %v1285_v31 }
  0x30   :  { %957 = vmatpush3.bf16.msra.mxu0 %v1076_v5  ;;  %v1085_v14 = vld [vmem:[#allocation5 + $0xe0] sm:$0xff]   ;;  %v1089_v18 = vld [vmem:[#allocation5 + $0xd8] sm:$0xff]   ;;  %v1092_v21 = vld [vmem:[#allocation5 + $0x10] sm:$0xff]  }
  0x31   :  { %958 = vmatprep.subr.bf16.mxu0 %v1079_v8  ;;  %v1086_v15 = vld [vmem:[#allocation5 + $0xa0] sm:$0xff]   ;;  %v1090_v19 = vld [vmem:[#allocation5 + $0x98] sm:$0xff]   ;;  %v1093_v22 = vld [vmem:[#allocation5 + $0xd0] sm:$0xff]  }
  0x32   :  { %979 = vmatpush3.bf16.msra.mxu1 %v1078_v7  ;;  %v1094_v26 = vld [vmem:[#allocation5 + $0x90] sm:$0xff]   ;;  %v1095_v27 = vld [vmem:[#allocation5 + $0x48] sm:$0xff]   ;;  %v1099_v33 = vld [vmem:[#allocation5 + $0x40] sm:$0xff]  }
  0x33   :  { %980 = vmatprep.subr.bf16.mxu1 %v1081_v10  ;;  %v1096_v28 = vld [vmem:[#allocation5 + $0x8] sm:$0xff]   ;;  %v1100_v34 = vld [vmem:[#allocation5] sm:$0xff]   ;;  %v1107_v42 = vld [vmem:[#allocation5 + $0x178] sm:$0xff]  }
  0x34   :  { %959 = vmatpush3.bf16.msra.mxu0 %v1080_v9  ;;  %v1097_v29 = vld [vmem:[#allocation5 + $0xc8] sm:$0xff]   ;;  %v1101_v35 = vld [vmem:[#allocation5 + $0xc0] sm:$0xff]   ;;  %v1110_v52 = vld [vmem:[#allocation5 + $0x138] sm:$0xff]  }
  0x35   :  { %960 = vmatprep.subr.bf16.mxu0 %v1083_v12  ;;  %v1098_v32 = vld [vmem:[#allocation5 + $0x88] sm:$0xff]   ;;  %v1104_v38 = vld [vmem:[#allocation2 + $0x1c] ss:$14 sps:$4 sm:$0xff]   ;;  %v1117_v63 = vld [vmem:[#allocation5 + $0x158] sm:$0xff]  }
  0x36   :  { %981 = vmatpush3.bf16.msra.mxu1 %v1082_v11  ;;  %v1102_v37 = vld [vmem:[#allocation2] ss:$14 sps:$4 sm:$0xff]   ;;  %v1106_v39 = vld [vmem:[#allocation5 + $0x80] sm:$0xff]   ;;  %v103_v41 = vrot.slane %v1104_v38, %v1288_v36  ;;  %v1108_v43 = vld [vmem:[#allocation2 + $0x4] ss:$14 sps:$4 sm:$0xff]  }
  0x37   :  { %982 = vmatprep.subr.bf16.mxu1 %v1085_v14  ;;  %v89_v40 = vrot.slane %v1102_v37, %v1288_v36  ;;  %v1109_v44 = vld [vmem:[#allocation2 + $0x20] ss:$14 sps:$4 sm:$0xff]   ;;  %v96_v48 = vrot.slane %v1108_v43, %v1288_v36  ;;  %v1115_v61 = vld [vmem:[#allocation5 + $0x160] sm:$0xff]   ;;  %v1129_v5 = vld [vmem:[#allocation2 + $0x24] ss:$14 sps:$4 sm:$0xff]  }
  0x38   :  { %961 = vmatpush3.bf16.msra.mxu0 %v1084_v13  ;;  %v110_v49 = vrot.slane %v1109_v44, %v1288_v36  ;;  %v1111_v55 = vld [vmem:[#allocation5 + $0x170] sm:$0xff]   ;;  %v1113_v59 = vld [vmem:[#allocation5 + $0x168] sm:$0xff]   ;;  %v1116_v62 = vld [vmem:[#allocation5 + $0x120] sm:$0xff]   ;;  %v139_v10 = vrot.slane %v1129_v5, %v1288_v36 }
  0x39   :  { %962 = vmatprep.subr.bf16.mxu0 %v1087_v16  ;;  %v112_v45 = vcombine.high %v89_v40, %v103_v41  ;;  %v111_v46 = vcombine.low %v89_v40, %v103_v41  ;;  %v1112_v58 = vld [vmem:[#allocation5 + $0x130] sm:$0xff]   ;;  %v1114_v60 = vld [vmem:[#allocation5 + $0x128] sm:$0xff]   ;;  %v1125_v0 = vld [vmem:[#allocation5 + $0x180] sm:$0xff]  }
  0x3a   :  { %983 = vmatpush3.bf16.msra.mxu1 %v1086_v15  ;;  %v114_v53 = vcombine.high %v96_v48, %v110_v49  ;;  %v113_v54 = vcombine.low %v96_v48, %v110_v49  ;;  %v1118_v1 = vld [vmem:[#allocation5 + $0x118] sm:$0xff]   ;;  %v1128_v3 = vld [vmem:[#allocation2 + $0xc] ss:$14 sps:$4 sm:$0x33]   ;;  %v1121_v12 = vld [vmem:[#allocation5 + $0x148] sm:$0xff]  }
  0x3b   :  { %984 = vmatprep.subr.bf16.mxu1 %v1089_v18  ;;  %v158_v50 = vpack.c.bf16 %v112_v45, %v112_v45  ;;  %v157_v51 = vpack.c.bf16 %v111_v46, %v111_v46  ;;  %v1126_v2 = vld [vmem:[#allocation2 + $0x8] ss:$14 sps:$4 sm:$0xff]   ;;  %v132_v8 = vrot.slane %v1128_v3, %v1288_v36  ;;  %v1135_v25 = vld [vmem:[#allocation7 + $0x20] sm:$0xff]  }
  0x3c   :  { %963 = vmatpush3.bf16.msra.mxu0 %v1088_v17  ;;  %v160_v56 = vpack.c.bf16 %v114_v53, %v114_v53  ;;  %v159_v57 = vpack.c.bf16 %v113_v54, %v113_v54  ;;  %v1119_v4 = vld [vmem:[#allocation5 + $0x150] sm:$0xff]   ;;  %v125_v7 = vrot.slane %v1126_v2, %v1288_v36  ;;  %v1122_v17 = vld [vmem:[#allocation5 + $0x108] sm:$0xff]   ;;  %v1123_v18 = vld [vmem:[#allocation5 + $0x140] sm:$0xff]  }
  0x3d   :  { %964 = vmatprep.subr.bf16.mxu0 %v1091_v20  ;;  %599 = vmatprep.mubr.bf16.mxu0 %v158_v50  ;;  %v1131_v6 = vld [vmem:[#allocation2 + $0x28] ss:$14 sps:$4 sm:$0x33]   ;;  %v1124_v20 = vld [vmem:[#allocation5 + $0x100] sm:$0xff]   ;;  %v892_v43 = vld [vmem:[%s1323_s2] ss:$0 sm:$0xff] }
  0x3e   :  { %985 = vmatpush3.bf16.msra.mxu1 %v1090_v19  ;;  %639 = vmatprep.mubr.bf16.mxu1 %v160_v56  ;;  %v1120_v9 = vld [vmem:[#allocation5 + $0x110] sm:$0xff]   ;;  %v146_v11 = vrot.slane %v1131_v6, %v1288_v36  ;;  %v148_v13 = vcombine.high %v125_v7, %v139_v10  ;;  %v147_v19 = vcombine.low %v125_v7, %v139_v10  ;;  %v1133_v23 = vld [vmem:[#allocation7 + $0x30] sm:$0xff]  }
  0x3f   :  { %986 = vmatprep.subr.bf16.mxu1 %v1093_v22  ;;  %v1132_v22 = vld [vmem:[#allocation7 + $0x38] sm:$0xff]   ;;  %v1134_v24 = vld [vmem:[#allocation7 + $0x28] sm:$0xff]  }
  0x40   :  { %965 = vmatpush3.bf16.msra.mxu0 %v1092_v21  ;;  %v149_v14 = vcombine.low %v132_v8, %v146_v11  ;;  %v162_v15 = vpack.c.bf16 %v148_v13, %v148_v13  ;;  %v161_v21 = vpack.c.bf16 %v147_v19, %v147_v19 }
  0x41   :  { %966 = vmatprep.subr.bf16.mxu0 %v1095_v27  ;;  %v1137_v27 = vld [vmem:[#allocation7 + $0x10] sm:$0xff]  }
  0x42   :  { %987 = vmatpush3.bf16.msra.mxu1 %v1094_v26  ;;  %v163_v16 = vpack.c.bf16 %v149_v14, %v149_v14  ;;  %v1136_v26 = vld [vmem:[#allocation7 + $0x18] sm:$0xff]  }
  0x43   :  { %988 = vmatprep.subr.bf16.mxu1 %v1097_v29  ;;  %v1139_v29 = vld [vmem:[#allocation7] sm:$0xff]  }
  0x44   :  { %967 = vmatpush3.bf16.msra.mxu0 %v1096_v28  ;;  %v1138_v28 = vld [vmem:[#allocation7 + $0x8] sm:$0xff]  }
  0x45   :  { %968 = vmatprep.subr.bf16.mxu0 %v1099_v33 }
  0x46   :  { %989 = vmatpush3.bf16.msra.mxu1 %v1098_v32 }
  0x47   :  { %990 = vmatprep.subr.bf16.mxu1 %v1101_v35 }
  0x48   :  { %969 = vmatpush3.bf16.msra.mxu0 %v1100_v34 }
  0x49   :  { %998 = vmatprep.subr.bf16.mxu0 %v1107_v42 }
  0x4a   :  { %991 = vmatpush3.bf16.msra.mxu1 %v1106_v39 }
  0x4b   :  { %1031 = vmatprep.subr.bf16.mxu1 %v1234_v47  ;;  %600 = vmatmul.mubr.bf16.vlgmr.msra.gmra.mxu0 %v157_v51 }
  0x4c   :  { %999 = vmatpush3.bf16.msra.mxu0 %v1110_v52  ;;  %679 = vmatprep.mubr.bf16.mxu0 %v162_v15 }
  0x4d   :  { %1000 = vmatprep.subr.bf16.mxu0 %v1111_v55  ;;  %640 = vmatmul.mubr.bf16.vlgmr.msra.gmra.mxu1 %v159_v57  ;;  %v1236_v57 = vmov 1966171168  }
  0x4e   :  { %1033 = vmatprep.mubr.msk.bf16.mxu1 %vm1235_vm0, %v1234_v47  ;;  %1032 = vmatpush3.bf16.msra.mxu1 %v1125_v0 }
  0x4f   :  { %1037 = vmatprep.subr.bf16.mxu1 %v1234_v47 }
  0x50   :  { %1001 = vmatpush3.bf16.msra.mxu0 %v1112_v58  ;;  %v843_v58 = vunpack.c.l.s4 %v1236_v57 }
  0x51   :  { %1002 = vmatprep.subr.bf16.mxu0 %v1113_v59 }
  0x52   :  { %v844_v59 = vunpack.c.0.s8 %v843_v58 }
  0x54   :  { %1003 = vmatpush3.bf16.msra.mxu0 %v1114_v60  ;;  %v943_v60 = vld [vmem:[%s1325_s4] ss:$0 sm:$0xff] }
  0x55   :  { %1004 = vmatprep.subr.bf16.mxu0 %v1115_v61  ;;  %1034 = vmatmul.mubr.msk.bf16.vlgmr.msra.gmra.mxu1 %vm563_vm1, %v163_v16 }
  0x56   :  { %1053 = vmatprep.mubr.msk.bf16.mxu1 %vm1235_vm0, %v1234_v47  ;;  %1038 = vmatpush3.bf16.msra.mxu1 %v1132_v22 }
  0x57   :  { %1039 = vmatprep.subr.bf16.mxu1 %v1234_v47 }
  0x58   :  { %1005 = vmatpush3.bf16.msra.mxu0 %v1116_v62 }
  0x59   :  { %1006 = vmatprep.subr.bf16.mxu0 %v1117_v63  ;;  %v847_v63 = vsub.s32 %v844_v59, %v1285_v31 }
  0x5a   :  { %1040 = vmatpush3.bf16.msra.mxu1 %v1133_v23 }
  0x5b   :  { %1041 = vmatprep.subr.bf16.mxu1 %v1234_v47 }
  0x5c   :  { %1007 = vmatpush3.bf16.msra.mxu0 %v1118_v1 }
  0x5d   :  { %1008 = vmatprep.subr.bf16.mxu0 %v1119_v4 }
  0x5e   :  { %1042 = vmatpush3.bf16.msra.mxu1 %v1134_v24 }
  0x5f   :  { %1043 = vmatprep.subr.bf16.mxu1 %v1234_v47 }
  0x60   :  { %1009 = vmatpush3.bf16.msra.mxu0 %v1120_v9 }
  0x61   :  { %1010 = vmatprep.subr.bf16.mxu0 %v1121_v12 }
  0x62   :  { %1044 = vmatpush3.bf16.msra.mxu1 %v1135_v25 }
  0x63   :  { %1045 = vmatprep.subr.bf16.mxu1 %v1234_v47 }
  0x64   :  { %1011 = vmatpush3.bf16.msra.mxu0 %v1122_v17 }
  0x65   :  { %1012 = vmatprep.subr.bf16.mxu0 %v1123_v18 }
  0x66   :  { %1046 = vmatpush3.bf16.msra.mxu1 %v1136_v26 }
  0x67   :  { %1047 = vmatprep.subr.bf16.mxu1 %v1234_v47 }
  0x68   :  { %1013 = vmatpush3.bf16.msra.mxu0 %v1124_v20 }
  0x6a   :  { %1048 = vmatpush3.bf16.msra.mxu1 %v1137_v27 }
  0x6b   :  { %680 = vmatmul.mubr.bf16.vlgmr.msra.gmra.mxu0 %v161_v21  ;;  %1049 = vmatprep.subr.bf16.mxu1 %v1234_v47 }
  0x6e   :  { %1050 = vmatpush3.bf16.msra.mxu1 %v1138_v28 }
  0x6f   :  { %1051 = vmatprep.subr.bf16.mxu1 %v1234_v47 }
  0x72   :  { %1052 = vmatpush3.bf16.msra.mxu1 %v1139_v29 }
 0x10b   :  { %v970_v30 = vpop.f32.mrf.mxu0 }
 0x10d   :  { %v971_v32 = vpop.f32.mrf.mxu0  ;;  %v992_v33 = vpop.f32.mrf.mxu1 }
 0x10e   :  { %v972_v42 = vadd.f32 %v971_v32, %v970_v30 }
 0x10f   :  { %v973_v34 = vpop.f32.mrf.mxu0  ;;  %v993_v35 = vpop.f32.mrf.mxu1 }
 0x110   :  { %v602_v45 = vadd.f32 %v972_v42, %v892_v43  ;;  %v994_v46 = vadd.f32 %v993_v35, %v992_v33 }
 0x111   :  { %v974_v36 = vpop.f32.mrf.mxu0  ;;  %v995_v37 = vpop.f32.mrf.mxu1 }
 0x112   :  { %v642_v49 = vadd.f32 %v994_v46, %v602_v45 }
 0x113   :  { %v996_v38 = vpop.f32.mrf.mxu1 }
 0x115   :  { %v721_v39 = vpop.f32.mrf.mxu1 }
 0x117   :  { %v1035_v40 = vpop.f32.mrf.mxu1 }
 0x119   :  { %v724_v41 = vpop.f32.mrf.mxu1 }
 0x11b   :  { %v1036_v44 = vpop.f32.mrf.mxu1 }
 0x12b   :  { %v1014_v47 = vpop.f32.mrf.mxu0 }
 0x12d   :  { %v1015_v48 = vpop.f32.mrf.mxu0 }
 0x12e   :  { %v1016_v50 = vadd.f32 %v1015_v48, %v1014_v47 }
 0x12f   :  { %v1017_v51 = vpop.f32.mrf.mxu0 }
 0x130   :  { %v682_v52 = vadd.f32 %v1016_v50, %v642_v49 }
 0x131   :  { %v1018_v53 = vpop.f32.mrf.mxu0 }
 0x132   :  { %v722_v54 = vadd.f32 %v721_v39, %v682_v52 }
 0x134   :  { %v727_v55 = vmax.f32 %v722_v54, 0.0 }
 0x136   :  { %v728_v56 = vpack.c.bf16 %v727_v55, %v727_v55 }
 0x138   :  { %1054 = vmatmul.mubr.bf16.vlgmr.msra.gmra.mxu1 %v728_v56 }
 0x1f8   :  { %v834_v61 = vpop.f32.mrf.mxu1 }
 0x1f9   :  { %v835_v62 = vadd.f32 %v943_v60, %v834_v61 }
 0x1fa   :  { %v1055_v0 = vpop.f32.mrf.mxu1 }
 0x1fb   :  { %v840_v1 = vpack.c.bf16 %v835_v62, %v835_v62 }
 0x1fc   :  { %v837_v2 = vpop.f32.mrf.mxu1 }
 0x1fd   :  { %v848_v3 = vrot.slane %v840_v1, %v847_v63 }
 0x1fe   :  { %v1056_v4 = vpop.f32.mrf.mxu1 }
 0x1ff   :  { %v849_v5 = vcombine.high %v848_v3, %v848_v3  ;;  %v856_v6 = vrot.slane %v848_v3, %v847_v63  ;;  %952 = vst.sshfl [vmem:[#allocation8] sm:$0x1 pattern:$0x73625140] %v848_v3 }
 0x201   :  { %v863_v7 = vrot.slane %v849_v5, %v847_v63  ;;  %v864_v8 = vcombine.high %v856_v6, %v856_v6  ;;  %953 = vst.sshfl [vmem:[#allocation8 + $0x1] sm:$0x1 pattern:$0x73625140] %v849_v5 }
 0x203   :  { %v865_v9 = vcombine.high %v863_v7, %v863_v7  ;;  %872 = vst [vmem:[#allocation8 + $0x2] sm:$0x1] %v864_v8 }
 0x205   :  { %873 = vst [vmem:[#allocation8 + $0x3] sm:$0x1] %v865_v9 }
 0x206   :  { %878 = vsyncadd [#allocation4], 48  ;;  %s1237_s2 = smov [#allocation8]  }
 0x207   :  { %s879_s4 = sshll.u32 %s1237_s2, 4  ;;  %s880_s4 = int_to_ptr.vmem [resolvable:$true] %s879_s4 }
 0x208   :  { %s1200_s14 = scalar_lea.vmem %s880_s4, 16  ;;  %s1204_s15 = scalar_lea.vmem %s880_s4, 64 }
 0x209   :  { %p1201_p1 = scmp.ne.s32.totalorder %s880_s4, %s1200_s14  ;;  %p1205_p2 = scmp.lt.s32.totalorder %s880_s4, %s880_s4 }
 0x20a   :  { %p1206_p3 = scmp.lt.s32.totalorder %s1204_s15, %s1200_s14 }
 0x20c   :  { %p1207_p4 = por %p1206_p3, %p1205_p2 }
 0x20e   :  { %p1208_p5 = pnand %p1207_p4, %p1201_p1 }
 0x210   :  { %1211 = shalt.err (!%p1208_p5)
}
 0x211   :  { %s1238_s16 = smov 16   ;;  %s1239_s17 = smov 1  }
 0x212   :  { %885 = dma.vmem_to_hbm [thread:$0]  %s880_s4, 16, %s1326_s5, [#allocation4], %s1238_s16, %s1238_s16, %s1239_s17  }
 0x213   :  { %1224 = dma.done.wait [#allocation4], 64  }
 0x214   :  { %1225 = vsyncadd [#allocation4], 4294967232 }
 0x215   :  { %889 = vsyncpa [#allocation3], 1 }
 0x216   :  { %890 = vsyncpa [#allocation6], 1 }
 0x217   :  { %891 = vsyncpa [#allocation4], 1 }

</bundles_post_ra>
